<compile_context>
chip_gen: v6e
topology: v6e:2x2x1
jax: 0.10.0
libtpu: 0.0.40
codegen_flags: <defaults>
</compile_context>

<pallas_src>
import jax
import jax.numpy as jnp
from jax.experimental import pallas as pl
from jax.experimental.pallas import tpu as pltpu


LANE = 128      # vreg lane width
SUBLANE = 8     # vreg sublane count (f32)


def _round_up(n, m):
    return (n + m - 1) // m * m


# ----------------------------- Pallas kernel ------------------------------- #

def _make_fused_gcn_kernel(num_layers, out_ch):
    """Fused forward: all GCN layers + masked log_softmax in one kernel."""

    def kernel(*refs):
        # refs = (adj, x, w0, b0, w1, b1, ..., w_{L-1}, b_{L-1}, o_ref)
        adj_ref, x_ref = refs[0], refs[1]
        o_ref = refs[-1]
        wb = refs[2:-1]

        a = adj_ref[...]          # bf16 [Np, Np], loaded into vregs once, reused by all layers
        h = x_ref[...]            # bf16 [Np, 128] lane-padded node features

        for l in range(num_layers):
            w = wb[2 * l][...]        # bf16 [P_in, P_out]
            b = wb[2 * l + 1][...]    # f32  [1, P_out]
            # X @ W on the MXU (bf16 inputs, f32 accumulation)
            z = jnp.dot(h.astype(jnp.bfloat16), w,
                        preferred_element_type=jnp.float32)
            # A_hat @ (X W) + b   (second MXU pass), epilogue in f32
            h = jnp.dot(a, z.astype(jnp.bfloat16),
                        preferred_element_type=jnp.float32) + b
            if l < num_layers - 1:
                h = jnp.maximum(h, 0.0)   # ReLU
                # TODO(synk): F.dropout is identity in eval mode; training-mode
                # dropout (pltpu.prng_seed + stateful_bernoulli) not implemented.

        # Masked log_softmax over the real `out_ch` lanes (padded lanes hold 0
        # logits and must not contribute to max / sum-exp).
        col = jax.lax.broadcasted_iota(jnp.int32, h.shape, dimension=1)
        valid = col < out_ch
        logits = jnp.where(valid, h, jnp.float32(-1e30))
        m = jnp.max(logits, axis=-1, keepdims=True)
        s = logits - m
        e = jnp.where(valid, jnp.exp(s), 0.0)
        lse = jnp.log(jnp.sum(e, axis=-1, keepdims=True))
        out = jnp.where(valid, s - lse, 0.0)
        o_ref[...] = out.astype(o_ref.dtype)   # lane-dense [Np, 128] store

    return kernel


# ------------------------------ JAX wrapper --------------------------------- #

def gcn_forward(x, adj, params):
    """Eval-mode GCN forward.

    x:      [N, Fin] f32 node features
    adj:    [N, N]   f32 symmetrically normalized dense adjacency (A_hat)
    params: list of (W [Fin_l, Fout_l] f32, b [Fout_l] f32)
    returns [N, out_ch] f32 log-probabilities.
    """
    n, f_in = x.shape
    num_layers = len(params)
    out_ch = params[-1][0].shape[1]

    n_p = _round_up(n, SUBLANE)
    dims = [f_in] + [w.shape[1] for w, _ in params]
    dims_p = [_round_up(d, LANE) for d in dims]

    # Zero padding is exact: padded feature columns / weight rows contribute 0.
    adj_p = jnp.zeros((n_p, n_p), jnp.bfloat16).at[:n, :n].set(
        adj.astype(jnp.bfloat16))
    x_p = jnp.zeros((n_p, dims_p[0]), jnp.bfloat16).at[:n, :f_in].set(
        x.astype(jnp.bfloat16))

    flat = []
    for l, (w, b) in enumerate(params):
        w_p = jnp.zeros((dims_p[l], dims_p[l + 1]), jnp.bfloat16)
        w_p = w_p.at[: w.shape[0], : w.shape[1]].set(w.astype(jnp.bfloat16))
        b_p = jnp.zeros((1, dims_p[l + 1]), jnp.float32)
        b_p = b_p.at[0, : w.shape[1]].set(b.reshape(-1).astype(jnp.float32))
        flat += [w_p, b_p]

    vmem = pl.BlockSpec(memory_space=pltpu.MemorySpace.VMEM)

    flops = 0
    for l in range(num_layers):
        flops += 2 * n_p * dims_p[l] * dims_p[l + 1]     # X @ W
        flops += 2 * n_p * n_p * dims_p[l + 1]           # A @ (XW)
    bytes_accessed = int(
        adj_p.size * 2 + x_p.size * 2
        + sum(a.size * a.dtype.itemsize for a in flat)
        + n_p * dims_p[-1] * 4)

    out_p = pl.pallas_call(
        _make_fused_gcn_kernel(num_layers, out_ch),
        out_shape=jax.ShapeDtypeStruct((n_p, dims_p[-1]), jnp.float32),
        in_specs=[vmem] * (2 + len(flat)),
        out_specs=vmem,
        compiler_params=pltpu.CompilerParams(
            vmem_limit_bytes=48 * 1024 * 1024),     # above 16/32 MiB defaults, under v7x 64 MiB
        cost_estimate=pl.CostEstimate(
            flops=flops,
            transcendentals=n_p * dims_p[-1],
            bytes_accessed=bytes_accessed),
    )(adj_p, x_p, *flat)

    return out_p[:n, :out_ch]


# --------------------------- reference (same math) --------------------------- #

def gcn_reference(x, adj, params):
    """Pure-JAX reference mirroring the kernel's bf16-input / f32-acc math."""
    a = adj.astype(jnp.bfloat16)
    h = x
    num_layers = len(params)
    for l, (w, b) in enumerate(params):
        z = jnp.dot(h.astype(jnp.bfloat16), w.astype(jnp.bfloat16),
                    preferred_element_type=jnp.float32)
        h = jnp.dot(a, z.astype(jnp.bfloat16),
                    preferred_element_type=jnp.float32) + b.reshape(1, -1)
        if l < num_layers - 1:
            h = jnp.maximum(h, 0.0)
    return jax.nn.log_softmax(h, axis=-1)


# --------------------------- parameter / data setup -------------------------- #

def init_params(key, in_channels, hidden_channels, out_channels, num_layers):
    dims = [in_channels] + [hidden_channels] * (num_layers - 1) + [out_channels]
    params = []
    for i in range(num_layers):
        key, wk = jax.random.split(key)
        fan_in, fan_out = dims[i], dims[i + 1]
        limit = jnp.sqrt(6.0 / (fan_in + fan_out))          # glorot (GCNConv default)
        w = jax.random.uniform(wk, (fan_in, fan_out), jnp.float32, -limit, limit)
        b = jnp.zeros((fan_out,), jnp.float32)              # GCNConv bias init = zeros
        params.append((w, b))
    return params


def make_normalized_adj(key, n):
    """Dense symmetric random graph, then A_hat = D^-1/2 (A + I) D^-1/2."""
    a = (jax.random.uniform(key, (n, n)) < 0.05).astype(jnp.float32)
    a = jnp.maximum(a, a.T)
    a = a + jnp.eye(n, dtype=jnp.float32)
    deg = jnp.sum(a, axis=1)
    d_inv_sqrt = 1.0 / jnp.sqrt(deg)
    return a * d_inv_sqrt[:, None] * d_inv_sqrt[None, :]


# ---------------------------------- main ------------------------------------ #

if __name__ == "__main__":
    key = jax.random.PRNGKey(0)
    k_x, k_adj, k_p = jax.random.split(key, 3)

    N = 128                 # nodes
    IN_CH, HID_CH, OUT_CH = 16, 32, 8
    NUM_LAYERS = 3

    x = jax.random.normal(k_x, (N, IN_CH), jnp.float32)
    adj = make_normalized_adj(k_adj, N)
    params = init_params(k_p, IN_CH, HID_CH, OUT_CH, NUM_LAYERS)

    out = jax.jit(gcn_forward)(x, adj, params)
    out = jax.block_until_ready(out)

    assert out.shape == (N, OUT_CH)
    # log_softmax rows must sum to ~1 in prob space
    assert jnp.allclose(jnp.sum(jnp.exp(out), axis=-1), 1.0, atol=1e-4)
    # matches a pure-JAX reference using identical bf16-input / f32-acc math
    ref = gcn_reference(x, adj, params)
    assert jnp.allclose(out, ref, atol=2e-3, rtol=2e-3), float(
        jnp.max(jnp.abs(out - ref)))
    print("KERNEL_OK")
</pallas_src>

<mosaic_0001>
module attributes {stable_mosaic.version = 11 : i64} {
  func.func @kernel(%arg0: memref<128x128xbf16, #tpu.memory_space<vmem>>, %arg1: memref<128x128xbf16, #tpu.memory_space<vmem>>, %arg2: memref<128x128xbf16, #tpu.memory_space<vmem>>, %arg3: memref<1x128xf32, #tpu.memory_space<vmem>>, %arg4: memref<128x128xbf16, #tpu.memory_space<vmem>>, %arg5: memref<1x128xf32, #tpu.memory_space<vmem>>, %arg6: memref<128x128xbf16, #tpu.memory_space<vmem>>, %arg7: memref<1x128xf32, #tpu.memory_space<vmem>>, %arg8: memref<128x128xf32, #tpu.memory_space<vmem>>) attributes {dimension_semantics = [], scalar_prefetch = 0 : i64, scratch_operands = 0 : i64, tpu.core_type = #tpu.core_type<tc>} {
    %c0 = arith.constant 0 : index
    %c0_0 = arith.constant 0 : index
    %0 = vector.load %arg0[%c0, %c0_0] : memref<128x128xbf16, #tpu.memory_space<vmem>>, vector<128x128xbf16>
    %c0_1 = arith.constant 0 : index
    %c0_2 = arith.constant 0 : index
    %1 = vector.load %arg1[%c0_1, %c0_2] : memref<128x128xbf16, #tpu.memory_space<vmem>>, vector<128x128xbf16>
    %c0_3 = arith.constant 0 : index
    %c0_4 = arith.constant 0 : index
    %2 = vector.load %arg2[%c0_3, %c0_4] : memref<128x128xbf16, #tpu.memory_space<vmem>>, vector<128x128xbf16>
    %c0_5 = arith.constant 0 : index
    %c0_6 = arith.constant 0 : index
    %3 = vector.load %arg3[%c0_5, %c0_6] : memref<1x128xf32, #tpu.memory_space<vmem>>, vector<1x128xf32>
    %cst = arith.constant dense<0.000000e+00> : vector<128x128xf32>
    %4 = tpu.matmul %1, %2, %cst {dimension_numbers = #tpu.dot_dimension_numbers<[1], [0], [0], [1], [0, 0, 1, 1], [], []>} : vector<128x128xbf16>, vector<128x128xbf16>, vector<128x128xf32> -> vector<128x128xf32>
    %5 = arith.truncf %4 : vector<128x128xf32> to vector<128x128xbf16>
    %cst_7 = arith.constant dense<0.000000e+00> : vector<128x128xf32>
    %6 = tpu.matmul %0, %5, %cst_7 {dimension_numbers = #tpu.dot_dimension_numbers<[1], [0], [0], [1], [0, 0, 1, 1], [], []>} : vector<128x128xbf16>, vector<128x128xbf16>, vector<128x128xf32> -> vector<128x128xf32>
    %7 = vector.broadcast %3 : vector<1x128xf32> to vector<128x128xf32>
    %8 = arith.addf %6, %7 : vector<128x128xf32>
    %cst_8 = arith.constant 0.000000e+00 : f32
    %9 = vector.broadcast %cst_8 : f32 to vector<128x128xf32>
    %10 = arith.maximumf %8, %9 : vector<128x128xf32>
    %c0_9 = arith.constant 0 : index
    %c0_10 = arith.constant 0 : index
    %11 = vector.load %arg4[%c0_9, %c0_10] : memref<128x128xbf16, #tpu.memory_space<vmem>>, vector<128x128xbf16>
    %c0_11 = arith.constant 0 : index
    %c0_12 = arith.constant 0 : index
    %12 = vector.load %arg5[%c0_11, %c0_12] : memref<1x128xf32, #tpu.memory_space<vmem>>, vector<1x128xf32>
    %13 = arith.truncf %10 : vector<128x128xf32> to vector<128x128xbf16>
    %cst_13 = arith.constant dense<0.000000e+00> : vector<128x128xf32>
    %14 = tpu.matmul %13, %11, %cst_13 {dimension_numbers = #tpu.dot_dimension_numbers<[1], [0], [0], [1], [0, 0, 1, 1], [], []>} : vector<128x128xbf16>, vector<128x128xbf16>, vector<128x128xf32> -> vector<128x128xf32>
    %15 = arith.truncf %14 : vector<128x128xf32> to vector<128x128xbf16>
    %cst_14 = arith.constant dense<0.000000e+00> : vector<128x128xf32>
    %16 = tpu.matmul %0, %15, %cst_14 {dimension_numbers = #tpu.dot_dimension_numbers<[1], [0], [0], [1], [0, 0, 1, 1], [], []>} : vector<128x128xbf16>, vector<128x128xbf16>, vector<128x128xf32> -> vector<128x128xf32>
    %17 = vector.broadcast %12 : vector<1x128xf32> to vector<128x128xf32>
    %18 = arith.addf %16, %17 : vector<128x128xf32>
    %cst_15 = arith.constant 0.000000e+00 : f32
    %19 = vector.broadcast %cst_15 : f32 to vector<128x128xf32>
    %20 = arith.maximumf %18, %19 : vector<128x128xf32>
    %c0_16 = arith.constant 0 : index
    %c0_17 = arith.constant 0 : index
    %21 = vector.load %arg6[%c0_16, %c0_17] : memref<128x128xbf16, #tpu.memory_space<vmem>>, vector<128x128xbf16>
    %c0_18 = arith.constant 0 : index
    %c0_19 = arith.constant 0 : index
    %22 = vector.load %arg7[%c0_18, %c0_19] : memref<1x128xf32, #tpu.memory_space<vmem>>, vector<1x128xf32>
    %23 = arith.truncf %20 : vector<128x128xf32> to vector<128x128xbf16>
    %cst_20 = arith.constant dense<0.000000e+00> : vector<128x128xf32>
    %24 = tpu.matmul %23, %21, %cst_20 {dimension_numbers = #tpu.dot_dimension_numbers<[1], [0], [0], [1], [0, 0, 1, 1], [], []>} : vector<128x128xbf16>, vector<128x128xbf16>, vector<128x128xf32> -> vector<128x128xf32>
    %25 = arith.truncf %24 : vector<128x128xf32> to vector<128x128xbf16>
    %cst_21 = arith.constant dense<0.000000e+00> : vector<128x128xf32>
    %26 = tpu.matmul %0, %25, %cst_21 {dimension_numbers = #tpu.dot_dimension_numbers<[1], [0], [0], [1], [0, 0, 1, 1], [], []>} : vector<128x128xbf16>, vector<128x128xbf16>, vector<128x128xf32> -> vector<128x128xf32>
    %27 = vector.broadcast %22 : vector<1x128xf32> to vector<128x128xf32>
    %28 = arith.addf %26, %27 : vector<128x128xf32>
    %29 = tpu.iota {dimensions = array<i32: 1>} : vector<128x128xi32>
    %c8_i32 = arith.constant 8 : i32
    %30 = vector.broadcast %c8_i32 : i32 to vector<128x128xi32>
    %31 = arith.cmpi slt, %29, %30 : vector<128x128xi32>
    %cst_22 = arith.constant -1.000000e+30 : f32
    %32 = vector.broadcast %cst_22 : f32 to vector<128x128xf32>
    %33 = arith.select %31, %28, %32 : vector<128x128xi1>, vector<128x128xf32>
    %cst_23 = arith.constant dense<0xFF800000> : vector<128xf32>
    %34 = vector.multi_reduction <maximumf>, %33, %cst_23 [1] : vector<128x128xf32> to vector<128xf32>
    %35 = vector.shape_cast %34 : vector<128xf32> to vector<128x1xf32>
    %36 = vector.broadcast %35 : vector<128x1xf32> to vector<128x128xf32>
    %37 = arith.subf %33, %36 : vector<128x128xf32>
    %38 = math.exp %37 : vector<128x128xf32>
    %cst_24 = arith.constant 0.000000e+00 : f32
    %39 = vector.broadcast %cst_24 : f32 to vector<128x128xf32>
    %40 = arith.select %31, %38, %39 : vector<128x128xi1>, vector<128x128xf32>
    %cst_25 = arith.constant dense<0.000000e+00> : vector<128xf32>
    %41 = vector.multi_reduction <add>, %40, %cst_25 [1] : vector<128x128xf32> to vector<128xf32>
    %42 = vector.shape_cast %41 : vector<128xf32> to vector<128x1xf32>
    %43 = math.log %42 : vector<128x1xf32>
    %44 = vector.broadcast %43 : vector<128x1xf32> to vector<128x128xf32>
    %45 = arith.subf %37, %44 : vector<128x128xf32>
    %cst_26 = arith.constant 0.000000e+00 : f32
    %46 = vector.broadcast %cst_26 : f32 to vector<128x128xf32>
    %47 = arith.select %31, %45, %46 : vector<128x128xi1>, vector<128x128xf32>
    %c0_27 = arith.constant 0 : index
    %c0_28 = arith.constant 0 : index
    %48 = vector.load %arg8[%c0_27, %c0_28] : memref<128x128xf32, #tpu.memory_space<vmem>>, vector<128x128xf32>
    tpu.vector_store %arg8[%c0_27, %c0_28], %47 {strides = array<i32>} : memref<128x128xf32, #tpu.memory_space<vmem>>, vector<128x128xf32>,
    return
  }
}

</mosaic_0001>

<bundles_post_ra>
// kernel: gcn_forward.1
= control target key start
LH: loop header
LB: loop body
LE: loop exit
PB: predicated region body
PF: predicated region fallthrough
CT: control target
= control target key end

     0   :  { %s2140_s2 = inlined_call_operand.vmem [shape: bf16[128,128], index: 2, kind: input, shape index: {}]   ;;  %s2141_s1 = inlined_call_operand.vmem [shape: bf16[128,128], index: 1, kind: input, shape index: {}]   ;;  %s2142_s0 = inlined_call_operand.vmem [shape: bf16[128,128], index: 0, kind: input, shape index: {}]   ;;  %s2143_s4 = inlined_call_operand.vmem [shape: bf16[128,128], index: 4, kind: input, shape index: {}]   ;;  %s2144_s3 = inlined_call_operand.vmem [shape: f32[1,128], index: 3, kind: input, shape index: {}]   ;;  %s2145_s6 = inlined_call_operand.vmem [shape: bf16[128,128], index: 6, kind: input, shape index: {}]   ;;  %s2146_s5 = inlined_call_operand.vmem [shape: f32[1,128], index: 5, kind: input, shape index: {}]   ;;  %s2147_s7 = inlined_call_operand.vmem [shape: f32[1,128], index: 7, kind: input, shape index: {}]   ;;  %s2148_s8 = inlined_call_operand.vmem [shape: f32[128,128], index: 8, kind: output, shape index: {}]  }
   0x1   :  { %v1587_v0 = vld [vmem:[%s2140_s2 + $0x38] sm:$0xff]   ;;  %v1588_v1 = vld [vmem:[%s2140_s2 + $0x30] sm:$0xff]   ;;  %v1589_v2 = vld [vmem:[%s2140_s2 + $0x28] sm:$0xff]  }
   0x2   :  { %1395 = vmatprep.subr.bf16.mxu0 %v1587_v0  ;;  %v1590_v3 = vld [vmem:[%s2140_s2 + $0x20] sm:$0xff]   ;;  %v1591_v5 = vld [vmem:[%s2140_s2 + $0x18] sm:$0xff]   ;;  %v1592_v6 = vld [vmem:[%s2140_s2 + $0x10] sm:$0xff]  }
   0x3   :  { %1396 = vmatpush3.bf16.msra.mxu0 %v1587_v0  ;;  %v1595_v4 = vld [vmem:[%s2141_s1] sm:$0xff]   ;;  %v1593_v7 = vld [vmem:[%s2140_s2 + $0x8] sm:$0xff]   ;;  %v1597_v10 = vld [vmem:[%s2141_s1 + $0x10] sm:$0xff]  }
   0x4   :  { %1397 = vmatprep.subr.bf16.mxu0 %v1588_v1  ;;  %1411 = vmatprep.mubr.bf16.mxu0 %v1595_v4  ;;  %v1594_v8 = vld [vmem:[%s2140_s2] sm:$0xff]   ;;  %v1596_v9 = vld [vmem:[%s2141_s1 + $0x8] sm:$0xff]   ;;  %v1598_v11 = vld [vmem:[%s2141_s1 + $0x18] sm:$0xff]  }
   0x5   :  { %v1599_v12 = vld [vmem:[%s2141_s1 + $0x20] sm:$0xff]   ;;  %v1600_v13 = vld [vmem:[%s2141_s1 + $0x28] sm:$0xff]   ;;  %v1601_v14 = vld [vmem:[%s2141_s1 + $0x30] sm:$0xff]  }
   0x6   :  { %v1602_v15 = vld [vmem:[%s2141_s1 + $0x38] sm:$0xff]   ;;  %v1787_v16 = vld [vmem:[%s2142_s0] sm:$0xff]   ;;  %v1612_v18 = vld [vmem:[%s2143_s4 + $0x30] sm:$0xff]  }
   0x7   :  { %1398 = vmatpush3.bf16.msra.mxu0 %v1588_v1  ;;  %1443 = vmatprep.mubr.bf16.mxu1 %v1787_v16  ;;  %v1611_v17 = vld [vmem:[%s2143_s4 + $0x38] sm:$0xff]   ;;  %v1613_v19 = vld [vmem:[%s2143_s4 + $0x28] sm:$0xff]   ;;  %v1614_v20 = vld [vmem:[%s2143_s4 + $0x20] sm:$0xff]  }
   0x8   :  { %1399 = vmatprep.subr.bf16.mxu0 %v1589_v2  ;;  %v1615_v21 = vld [vmem:[%s2143_s4 + $0x18] sm:$0xff]   ;;  %v1808_v46 = vld [vmem:[%s2142_s0 + $0x8] sm:$0xff]   ;;  %v1813_v47 = vld [vmem:[%s2142_s0 + $0x10] sm:$0xff]  }
   0x9   :  { %v1820_v48 = vld [vmem:[%s2142_s0 + $0x18] sm:$0xff]   ;;  %v1825_v49 = vld [vmem:[%s2142_s0 + $0x20] sm:$0xff]   ;;  %v1832_v50 = vld [vmem:[%s2142_s0 + $0x28] sm:$0xff]  }
   0xa   :  { %v1837_v51 = vld [vmem:[%s2142_s0 + $0x30] sm:$0xff]   ;;  %v1844_v52 = vld [vmem:[%s2142_s0 + $0x38] sm:$0xff]   ;;  %v1617_v54 = vld [vmem:[%s2143_s4 + $0x8] sm:$0xff]  }
   0xb   :  { %1400 = vmatpush3.bf16.msra.mxu0 %v1589_v2  ;;  %v1616_v53 = vld [vmem:[%s2143_s4 + $0x10] sm:$0xff]   ;;  %v1618_v55 = vld [vmem:[%s2143_s4] sm:$0xff]  }
   0xc   :  { %1401 = vmatprep.subr.bf16.mxu0 %v1590_v3  ;;  %v1272_v58 = vld [vmem:[%s2144_s3] ss:$0 sm:$0xff] }
   0xf   :  { %1402 = vmatpush3.bf16.msra.mxu0 %v1590_v3 }
  0x10   :  { %1403 = vmatprep.subr.bf16.mxu0 %v1591_v5 }
  0x13   :  { %1404 = vmatpush3.bf16.msra.mxu0 %v1591_v5 }
  0x14   :  { %1405 = vmatprep.subr.bf16.mxu0 %v1592_v6 }
  0x17   :  { %1406 = vmatpush3.bf16.msra.mxu0 %v1592_v6 }
  0x18   :  { %1407 = vmatprep.subr.bf16.mxu0 %v1593_v7 }
  0x1b   :  { %1408 = vmatpush3.bf16.msra.mxu0 %v1593_v7 }
  0x1c   :  { %1409 = vmatprep.subr.bf16.mxu0 %v1594_v8 }
  0x1f   :  { %1410 = vmatpush3.bf16.msra.mxu0 %v1594_v8 }
  0x20   :  { %1459 = vmatprep.subr.bf16.mxu0 %v1611_v17 }
  0x22   :  { %1412 = vmatmul.mubr.bf16.vlgmr.msra.gmra.mxu0 %v1596_v9 }
  0x23   :  { %1415 = vmatprep.mubr.bf16.mxu0 %v1597_v10  ;;  %1460 = vmatpush3.bf16.msra.mxu0 %v1611_v17 }
  0x24   :  { %1461 = vmatprep.subr.bf16.mxu0 %v1612_v18 }
  0x27   :  { %1462 = vmatpush3.bf16.msra.mxu0 %v1612_v18 }
  0x28   :  { %1463 = vmatprep.subr.bf16.mxu0 %v1613_v19 }
  0x2a   :  { %1416 = vmatmul.mubr.bf16.gmra.mxu0 %v1598_v11 }
  0x2b   :  { %1419 = vmatprep.mubr.bf16.mxu0 %v1599_v12  ;;  %1464 = vmatpush3.bf16.msra.mxu0 %v1613_v19 }
  0x2c   :  { %1465 = vmatprep.subr.bf16.mxu0 %v1614_v20 }
  0x2f   :  { %1466 = vmatpush3.bf16.msra.mxu0 %v1614_v20 }
  0x30   :  { %1467 = vmatprep.subr.bf16.mxu0 %v1615_v21 }
  0x32   :  { %1420 = vmatmul.mubr.bf16.gmra.mxu0 %v1600_v13 }
  0x33   :  { %1423 = vmatprep.mubr.bf16.mxu0 %v1601_v14  ;;  %1468 = vmatpush3.bf16.msra.mxu0 %v1615_v21 }
  0x34   :  { %1469 = vmatprep.subr.bf16.mxu0 %v1616_v53 }
  0x37   :  { %1470 = vmatpush3.bf16.msra.mxu0 %v1616_v53 }
  0x38   :  { %1471 = vmatprep.subr.bf16.mxu0 %v1617_v54 }
  0x3a   :  { %1424 = vmatmul.mubr.bf16.gmra.mxu0 %v1602_v15 }
  0x3b   :  { %1472 = vmatpush3.bf16.msra.mxu0 %v1617_v54 }
  0x3c   :  { %1473 = vmatprep.subr.bf16.mxu0 %v1618_v55 }
  0x3f   :  { %1474 = vmatpush3.bf16.msra.mxu0 %v1618_v55 }
  0xe2   :  { %v1413_v22 = vpop.f32.mrf.mxu0 }
  0xe4   :  { %v209_v23 = vpop.f32.mrf.mxu0 }
  0xe6   :  { %v1414_v24 = vpop.f32.mrf.mxu0 }
  0xe7   :  { %v273_v44 = vpack.c.bf16 %v1414_v24, %v1413_v22 }
  0xe8   :  { %v212_v25 = vpop.f32.mrf.mxu0 }
  0xe9   :  { %v272_v45 = vpack.c.bf16 %v212_v25, %v209_v23 }
  0xea   :  { %v1417_v26 = vpop.f32.mrf.mxu0 }
  0xec   :  { %v225_v27 = vpop.f32.mrf.mxu0 }
  0xee   :  { %v1418_v28 = vpop.f32.mrf.mxu0 }
  0xef   :  { %v275_v42 = vpack.c.bf16 %v1418_v28, %v1417_v26 }
  0xf0   :  { %v228_v29 = vpop.f32.mrf.mxu0 }
  0xf1   :  { %v274_v43 = vpack.c.bf16 %v228_v29, %v225_v27 }
  0xf2   :  { %v1421_v30 = vpop.f32.mrf.mxu0 }
  0xf4   :  { %v241_v31 = vpop.f32.mrf.mxu0 }
  0xf6   :  { %v1422_v32 = vpop.f32.mrf.mxu0 }
  0xf7   :  { %v277_v40 = vpack.c.bf16 %v1422_v32, %v1421_v30 }
  0xf8   :  { %v244_v33 = vpop.f32.mrf.mxu0 }
  0xf9   :  { %v276_v41 = vpack.c.bf16 %v244_v33, %v241_v31 }
  0xfa   :  { %v1425_v34 = vpop.f32.mrf.mxu0 }
  0xfc   :  { %v257_v35 = vpop.f32.mrf.mxu0 }
  0xfe   :  { %v1426_v36 = vpop.f32.mrf.mxu0 }
  0xff   :  { %v279_v37 = vpack.c.bf16 %v1426_v36, %v1425_v34 }
 0x100   :  { %v260_v38 = vpop.f32.mrf.mxu0 }
 0x101   :  { %v278_v39 = vpack.c.bf16 %v260_v38, %v257_v35  ;;  %1427 = vmatprep.subr.bf16.mxu1 %v279_v37 }
 0x102   :  { %1428 = vmatpush3.bf16.msra.mxu1 %v279_v37 }
 0x103   :  { %1429 = vmatprep.subr.bf16.mxu1 %v278_v39 }
 0x106   :  { %1430 = vmatpush3.bf16.msra.mxu1 %v278_v39 }
 0x107   :  { %1431 = vmatprep.subr.bf16.mxu1 %v277_v40 }
 0x10a   :  { %1432 = vmatpush3.bf16.msra.mxu1 %v277_v40 }
 0x10b   :  { %1433 = vmatprep.subr.bf16.mxu1 %v276_v41 }
 0x10e   :  { %1434 = vmatpush3.bf16.msra.mxu1 %v276_v41 }
 0x10f   :  { %1435 = vmatprep.subr.bf16.mxu1 %v275_v42 }
 0x112   :  { %1436 = vmatpush3.bf16.msra.mxu1 %v275_v42 }
 0x113   :  { %1437 = vmatprep.subr.bf16.mxu1 %v274_v43 }
 0x116   :  { %1438 = vmatpush3.bf16.msra.mxu1 %v274_v43 }
 0x117   :  { %1439 = vmatprep.subr.bf16.mxu1 %v273_v44 }
 0x11a   :  { %1440 = vmatpush3.bf16.msra.mxu1 %v273_v44 }
 0x11b   :  { %1441 = vmatprep.subr.bf16.mxu1 %v272_v45 }
 0x11e   :  { %1442 = vmatpush3.bf16.msra.mxu1 %v272_v45 }
 0x121   :  { %1444 = vmatmul.mubr.bf16.vlgmr.msra.gmra.mxu1 %v1808_v46 }
 0x122   :  { %1447 = vmatprep.mubr.bf16.mxu1 %v1813_v47 }
 0x129   :  { %1448 = vmatmul.mubr.bf16.gmra.mxu1 %v1820_v48 }
 0x12a   :  { %1451 = vmatprep.mubr.bf16.mxu1 %v1825_v49 }
 0x131   :  { %1452 = vmatmul.mubr.bf16.gmra.mxu1 %v1832_v50 }
 0x132   :  { %1455 = vmatprep.mubr.bf16.mxu1 %v1837_v51 }
 0x139   :  { %1456 = vmatmul.mubr.bf16.gmra.mxu1 %v1844_v52 }
 0x13a   :  { %1507 = vmatprep.mubr.bf16.mxu1 %v1787_v16 }
 0x1e1   :  { %v1445_v56 = vpop.f32.mrf.mxu1 }
 0x1e2   :  { %v377_v62 = vadd.f32 %v1445_v56, %v1272_v58 }
 0x1e3   :  { %v368_v57 = vpop.f32.mrf.mxu1 }
 0x1e4   :  { %v369_v60 = vadd.f32 %v1272_v58, %v368_v57  ;;  %v433_v5 = vmax.f32 %v377_v62, 0.0  ;;  %v1619_v57 = vld [vmem:[%s2145_s6 + $0x38] sm:$0xff]  }
 0x1e5   :  { %v1446_v59 = vpop.f32.mrf.mxu1  ;;  %1523 = vmatprep.subr.bf16.mxu0 %v1619_v57 }
 0x1e6   :  { %v380_v61 = vadd.f32 %v1446_v59, %v1272_v58  ;;  %v431_v3 = vmax.f32 %v369_v60, 0.0  ;;  %v1620_v59 = vld [vmem:[%s2145_s6 + $0x30] sm:$0xff]   ;;  %v1622_v60 = vld [vmem:[%s2145_s6 + $0x20] sm:$0xff]  }
 0x1e7   :  { %v371_v63 = vpop.f32.mrf.mxu1 }
 0x1e8   :  { %v372_v0 = vadd.f32 %v1272_v58, %v371_v63  ;;  %v434_v1 = vmax.f32 %v380_v61, 0.0  ;;  %v1623_v61 = vld [vmem:[%s2145_s6 + $0x18] sm:$0xff]  }
 0x1e9   :  { %v1449_v2 = vpop.f32.mrf.mxu1 }
 0x1ea   :  { %v432_v4 = vmax.f32 %v372_v0, 0.0  ;;  %v465_v8 = vpack.c.bf16 %v434_v1, %v433_v5  ;;  %v393_v12 = vadd.f32 %v1449_v2, %v1272_v58 }
 0x1eb   :  { %v384_v6 = vpop.f32.mrf.mxu1 }
 0x1ec   :  { %v464_v7 = vpack.c.bf16 %v432_v4, %v431_v3  ;;  %v385_v10 = vadd.f32 %v1272_v58, %v384_v6  ;;  %v437_v20 = vmax.f32 %v393_v12, 0.0 }
 0x1ed   :  { %v1450_v9 = vpop.f32.mrf.mxu1 }
 0x1ee   :  { %v396_v11 = vadd.f32 %v1450_v9, %v1272_v58  ;;  %1475 = vmatprep.mubr.bf16.mxu0 %v464_v7  ;;  %v435_v18 = vmax.f32 %v385_v10, 0.0 }
 0x1ef   :  { %v387_v13 = vpop.f32.mrf.mxu1  ;;  %1476 = vmatmul.mubr.bf16.vlgmr.msra.gmra.mxu0 %v465_v8 }
 0x1f0   :  { %v388_v14 = vadd.f32 %v1272_v58, %v387_v13  ;;  %v438_v15 = vmax.f32 %v396_v11, 0.0  ;;  %1524 = vmatpush3.bf16.msra.mxu0 %v1619_v57 }
 0x1f1   :  { %v1453_v17 = vpop.f32.mrf.mxu1  ;;  %1525 = vmatprep.subr.bf16.mxu0 %v1620_v59 }
 0x1f2   :  { %v436_v19 = vmax.f32 %v388_v14, 0.0  ;;  %v467_v23 = vpack.c.bf16 %v438_v15, %v437_v20  ;;  %v409_v27 = vadd.f32 %v1453_v17, %v1272_v58 }
 0x1f3   :  { %v400_v21 = vpop.f32.mrf.mxu1 }
 0x1f4   :  { %v466_v22 = vpack.c.bf16 %v436_v19, %v435_v18  ;;  %v401_v25 = vadd.f32 %v1272_v58, %v400_v21  ;;  %v441_v34 = vmax.f32 %v409_v27, 0.0  ;;  %1526 = vmatpush3.bf16.msra.mxu0 %v1620_v59  ;;  %v1289_v27 = vld [vmem:[%s2146_s5] ss:$0 sm:$0xff] }
 0x1f5   :  { %v1454_v24 = vpop.f32.mrf.mxu1 }
 0x1f6   :  { %v412_v26 = vadd.f32 %v1454_v24, %v1272_v58  ;;  %1479 = vmatprep.mubr.bf16.mxu0 %v466_v22  ;;  %v439_v32 = vmax.f32 %v401_v25, 0.0  ;;  %v1625_v24 = vld [vmem:[%s2145_s6 + $0x8] sm:$0xff]   ;;  %v1626_v25 = vld [vmem:[%s2145_s6] sm:$0xff]  }
 0x1f7   :  { %v403_v28 = vpop.f32.mrf.mxu1  ;;  %1480 = vmatmul.mubr.bf16.gmra.mxu0 %v467_v23  ;;  %v1624_v23 = vld [vmem:[%s2145_s6 + $0x10] sm:$0xff]  }
 0x1f8   :  { %v404_v29 = vadd.f32 %v1272_v58, %v403_v28  ;;  %v442_v30 = vmax.f32 %v412_v26, 0.0 }
 0x1f9   :  { %v1457_v31 = vpop.f32.mrf.mxu1 }
 0x1fa   :  { %v440_v33 = vmax.f32 %v404_v29, 0.0  ;;  %v469_v37 = vpack.c.bf16 %v442_v30, %v441_v34  ;;  %v425_v41 = vadd.f32 %v1457_v31, %v1272_v58 }
 0x1fb   :  { %v416_v35 = vpop.f32.mrf.mxu1 }
 0x1fc   :  { %v468_v36 = vpack.c.bf16 %v440_v33, %v439_v32  ;;  %v417_v39 = vadd.f32 %v1272_v58, %v416_v35  ;;  %v445_v54 = vmax.f32 %v425_v41, 0.0 }
 0x1fd   :  { %v1458_v38 = vpop.f32.mrf.mxu1 }
 0x1fe   :  { %v428_v40 = vadd.f32 %v1458_v38, %v1272_v58  ;;  %1483 = vmatprep.mubr.bf16.mxu0 %v468_v36  ;;  %v443_v45 = vmax.f32 %v417_v39, 0.0 }
 0x1ff   :  { %v419_v42 = vpop.f32.mrf.mxu1  ;;  %1484 = vmatmul.mubr.bf16.gmra.mxu0 %v469_v37 }
 0x200   :  { %v420_v43 = vadd.f32 %v1272_v58, %v419_v42  ;;  %v446_v44 = vmax.f32 %v428_v40, 0.0  ;;  %v1621_v58 = vld [vmem:[%s2145_s6 + $0x28] sm:$0xff]  }
 0x201   :  { %1527 = vmatprep.subr.bf16.mxu0 %v1621_v58 }
 0x202   :  { %v444_v53 = vmax.f32 %v420_v43, 0.0  ;;  %v471_v56 = vpack.c.bf16 %v446_v44, %v445_v54  ;;  %1528 = vmatpush3.bf16.msra.mxu0 %v1621_v58 }
 0x203   :  { %1529 = vmatprep.subr.bf16.mxu0 %v1622_v60 }
 0x204   :  { %v470_v55 = vpack.c.bf16 %v444_v53, %v443_v45 }
 0x206   :  { %1487 = vmatprep.mubr.bf16.mxu0 %v470_v55  ;;  %1530 = vmatpush3.bf16.msra.mxu0 %v1622_v60 }
 0x207   :  { %1488 = vmatmul.mubr.bf16.gmra.mxu0 %v471_v56  ;;  %1531 = vmatprep.subr.bf16.mxu0 %v1623_v61 }
 0x20a   :  { %1532 = vmatpush3.bf16.msra.mxu0 %v1623_v61 }
 0x20b   :  { %1533 = vmatprep.subr.bf16.mxu0 %v1624_v23 }
 0x20e   :  { %1534 = vmatpush3.bf16.msra.mxu0 %v1624_v23 }
 0x20f   :  { %1535 = vmatprep.subr.bf16.mxu0 %v1625_v24 }
 0x212   :  { %1536 = vmatpush3.bf16.msra.mxu0 %v1625_v24 }
 0x213   :  { %1537 = vmatprep.subr.bf16.mxu0 %v1626_v25 }
 0x216   :  { %1538 = vmatpush3.bf16.msra.mxu0 %v1626_v25 }
 0x2af   :  { %v1477_v62 = vpop.f32.mrf.mxu0 }
 0x2b1   :  { %v554_v63 = vpop.f32.mrf.mxu0 }
 0x2b3   :  { %v1478_v0 = vpop.f32.mrf.mxu0 }
 0x2b4   :  { %v618_v21 = vpack.c.bf16 %v1478_v0, %v1477_v62 }
 0x2b5   :  { %v557_v1 = vpop.f32.mrf.mxu0 }
 0x2b6   :  { %v617_v22 = vpack.c.bf16 %v557_v1, %v554_v63 }
 0x2b7   :  { %v1481_v2 = vpop.f32.mrf.mxu0 }
 0x2b9   :  { %v570_v3 = vpop.f32.mrf.mxu0 }
 0x2bb   :  { %v1482_v4 = vpop.f32.mrf.mxu0 }
 0x2bc   :  { %v620_v19 = vpack.c.bf16 %v1482_v4, %v1481_v2 }
 0x2bd   :  { %v573_v5 = vpop.f32.mrf.mxu0 }
 0x2be   :  { %v619_v20 = vpack.c.bf16 %v573_v5, %v570_v3 }
 0x2bf   :  { %v1485_v6 = vpop.f32.mrf.mxu0 }
 0x2c1   :  { %v586_v7 = vpop.f32.mrf.mxu0 }
 0x2c3   :  { %v1486_v8 = vpop.f32.mrf.mxu0 }
 0x2c4   :  { %v622_v17 = vpack.c.bf16 %v1486_v8, %v1485_v6 }
 0x2c5   :  { %v589_v9 = vpop.f32.mrf.mxu0 }
 0x2c6   :  { %v621_v18 = vpack.c.bf16 %v589_v9, %v586_v7 }
 0x2c7   :  { %v1489_v10 = vpop.f32.mrf.mxu0 }
 0x2c9   :  { %v602_v11 = vpop.f32.mrf.mxu0 }
 0x2cb   :  { %v1490_v12 = vpop.f32.mrf.mxu0 }
 0x2cc   :  { %v624_v13 = vpack.c.bf16 %v1490_v12, %v1489_v10 }
 0x2cd   :  { %v605_v14 = vpop.f32.mrf.mxu0 }
 0x2ce   :  { %v623_v15 = vpack.c.bf16 %v605_v14, %v602_v11  ;;  %1491 = vmatprep.subr.bf16.mxu1 %v624_v13 }
 0x2cf   :  { %1492 = vmatpush3.bf16.msra.mxu1 %v624_v13 }
 0x2d0   :  { %1493 = vmatprep.subr.bf16.mxu1 %v623_v15 }
 0x2d3   :  { %1494 = vmatpush3.bf16.msra.mxu1 %v623_v15 }
 0x2d4   :  { %1495 = vmatprep.subr.bf16.mxu1 %v622_v17 }
 0x2d7   :  { %1496 = vmatpush3.bf16.msra.mxu1 %v622_v17 }
 0x2d8   :  { %1497 = vmatprep.subr.bf16.mxu1 %v621_v18 }
 0x2db   :  { %1498 = vmatpush3.bf16.msra.mxu1 %v621_v18 }
 0x2dc   :  { %1499 = vmatprep.subr.bf16.mxu1 %v620_v19 }
 0x2df   :  { %1500 = vmatpush3.bf16.msra.mxu1 %v620_v19 }
 0x2e0   :  { %1501 = vmatprep.subr.bf16.mxu1 %v619_v20 }
 0x2e3   :  { %1502 = vmatpush3.bf16.msra.mxu1 %v619_v20 }
 0x2e4   :  { %1503 = vmatprep.subr.bf16.mxu1 %v618_v21 }
 0x2e7   :  { %1504 = vmatpush3.bf16.msra.mxu1 %v618_v21 }
 0x2e8   :  { %1505 = vmatprep.subr.bf16.mxu1 %v617_v22 }
 0x2eb   :  { %1506 = vmatpush3.bf16.msra.mxu1 %v617_v22 }
 0x2ee   :  { %1508 = vmatmul.mubr.bf16.vlgmr.msra.gmra.mxu1 %v1808_v46 }
 0x2ef   :  { %1511 = vmatprep.mubr.bf16.mxu1 %v1813_v47 }
 0x2f6   :  { %1512 = vmatmul.mubr.bf16.gmra.mxu1 %v1820_v48 }
 0x2f7   :  { %1515 = vmatprep.mubr.bf16.mxu1 %v1825_v49 }
 0x2fe   :  { %1516 = vmatmul.mubr.bf16.gmra.mxu1 %v1832_v50 }
 0x2ff   :  { %1519 = vmatprep.mubr.bf16.mxu1 %v1837_v51 }
 0x306   :  { %1520 = vmatmul.mubr.bf16.gmra.mxu1 %v1844_v52 }
 0x307   :  { %1571 = vmatprep.mubr.bf16.mxu1 %v1787_v16 }
 0x3ae   :  { %v1509_v26 = vpop.f32.mrf.mxu1 }
 0x3af   :  { %v674_v31 = vadd.f32 %v1509_v26, %v1289_v27 }
 0x3b0   :  { %v665_v16 = vpop.f32.mrf.mxu1 }
 0x3b1   :  { %v666_v29 = vadd.f32 %v1289_v27, %v665_v16  ;;  %v730_v38 = vmax.f32 %v674_v31, 0.0 }
 0x3b2   :  { %v1510_v28 = vpop.f32.mrf.mxu1 }
 0x3b3   :  { %v677_v30 = vadd.f32 %v1510_v28, %v1289_v27  ;;  %v728_v36 = vmax.f32 %v666_v29, 0.0 }
 0x3b4   :  { %v668_v32 = vpop.f32.mrf.mxu1 }
 0x3b5   :  { %v669_v33 = vadd.f32 %v1289_v27, %v668_v32  ;;  %v731_v34 = vmax.f32 %v677_v30, 0.0 }
 0x3b6   :  { %v1513_v35 = vpop.f32.mrf.mxu1 }
 0x3b7   :  { %v729_v37 = vmax.f32 %v669_v33, 0.0  ;;  %v762_v41 = vpack.c.bf16 %v731_v34, %v730_v38  ;;  %v690_v45 = vadd.f32 %v1513_v35, %v1289_v27 }
 0x3b8   :  { %v681_v39 = vpop.f32.mrf.mxu1 }
 0x3b9   :  { %v761_v40 = vpack.c.bf16 %v729_v37, %v728_v36  ;;  %v682_v43 = vadd.f32 %v1289_v27, %v681_v39  ;;  %v734_v58 = vmax.f32 %v690_v45, 0.0 }
 0x3ba   :  { %v1514_v42 = vpop.f32.mrf.mxu1 }
 0x3bb   :  { %v693_v44 = vadd.f32 %v1514_v42, %v1289_v27  ;;  %1539 = vmatprep.mubr.bf16.mxu0 %v761_v40  ;;  %v732_v57 = vmax.f32 %v682_v43, 0.0 }
 0x3bc   :  { %v684_v53 = vpop.f32.mrf.mxu1  ;;  %1540 = vmatmul.mubr.bf16.vlgmr.msra.gmra.mxu0 %v762_v41 }
 0x3bd   :  { %v685_v54 = vadd.f32 %v1289_v27, %v684_v53  ;;  %v735_v55 = vmax.f32 %v693_v44, 0.0 }
 0x3be   :  { %v1517_v56 = vpop.f32.mrf.mxu1 }
 0x3bf   :  { %v733_v59 = vmax.f32 %v685_v54, 0.0  ;;  %v764_v62 = vpack.c.bf16 %v735_v55, %v734_v58  ;;  %v706_v2 = vadd.f32 %v1517_v56, %v1289_v27  ;;  %v1025_v56 = vlaneseq }
 0x3c0   :  { %v697_v60 = vpop.f32.mrf.mxu1 }
 0x3c1   :  { %v763_v61 = vpack.c.bf16 %v733_v59, %v732_v57  ;;  %v698_v0 = vadd.f32 %v1289_v27, %v697_v60  ;;  %v738_v9 = vmax.f32 %v706_v2, 0.0  ;;  %v1902_v57 = vand.u32 127, %v1025_v56  ;;  %v1298_v59 = vld [vmem:[%s2147_s7] ss:$0 sm:$0xff] }
 0x3c2   :  { %v1518_v63 = vpop.f32.mrf.mxu1 }
 0x3c3   :  { %v709_v1 = vadd.f32 %v1518_v63, %v1289_v27  ;;  %1543 = vmatprep.mubr.bf16.mxu0 %v763_v61  ;;  %v736_v7 = vmax.f32 %v698_v0, 0.0  ;;  %vm1027_vm0 = vcmp.lt.s32.totalorder %v1902_v57, 8 }
 0x3c4   :  { %v700_v3 = vpop.f32.mrf.mxu1  ;;  %1544 = vmatmul.mubr.bf16.gmra.mxu0 %v764_v62 }
 0x3c5   :  { %v701_v4 = vadd.f32 %v1289_v27, %v700_v3  ;;  %v739_v5 = vmax.f32 %v709_v1, 0.0 }
 0x3c6   :  { %v1521_v6 = vpop.f32.mrf.mxu1 }
 0x3c7   :  { %v737_v8 = vmax.f32 %v701_v4, 0.0  ;;  %v766_v12 = vpack.c.bf16 %v739_v5, %v738_v9  ;;  %v722_v17 = vadd.f32 %v1521_v6, %v1289_v27 }
 0x3c8   :  { %v713_v10 = vpop.f32.mrf.mxu1 }
 0x3c9   :  { %v765_v11 = vpack.c.bf16 %v737_v8, %v736_v7  ;;  %v714_v14 = vadd.f32 %v1289_v27, %v713_v10  ;;  %v742_v23 = vmax.f32 %v722_v17, 0.0 }
 0x3ca   :  { %v1522_v13 = vpop.f32.mrf.mxu1 }
 0x3cb   :  { %v725_v15 = vadd.f32 %v1522_v13, %v1289_v27  ;;  %1547 = vmatprep.mubr.bf16.mxu0 %v765_v11  ;;  %v740_v21 = vmax.f32 %v714_v14, 0.0 }
 0x3cc   :  { %v716_v18 = vpop.f32.mrf.mxu1  ;;  %1548 = vmatmul.mubr.bf16.gmra.mxu0 %v766_v12 }
 0x3cd   :  { %v717_v19 = vadd.f32 %v1289_v27, %v716_v18  ;;  %v743_v20 = vmax.f32 %v725_v15, 0.0 }
 0x3cf   :  { %v741_v22 = vmax.f32 %v717_v19, 0.0  ;;  %v768_v25 = vpack.c.bf16 %v743_v20, %v742_v23 }
 0x3d1   :  { %v767_v24 = vpack.c.bf16 %v741_v22, %v740_v21 }
 0x3d3   :  { %1551 = vmatprep.mubr.bf16.mxu0 %v767_v24 }
 0x3d4   :  { %1552 = vmatmul.mubr.bf16.gmra.mxu0 %v768_v25 }
 0x47c   :  { %v1541_v26 = vpop.f32.mrf.mxu0 }
 0x47e   :  { %v851_v16 = vpop.f32.mrf.mxu0 }
 0x480   :  { %v1542_v28 = vpop.f32.mrf.mxu0 }
 0x481   :  { %v915_v54 = vpack.c.bf16 %v1542_v28, %v1541_v26 }
 0x482   :  { %v854_v29 = vpop.f32.mrf.mxu0 }
 0x483   :  { %v914_v55 = vpack.c.bf16 %v854_v29, %v851_v16 }
 0x484   :  { %v1545_v30 = vpop.f32.mrf.mxu0 }
 0x486   :  { %v867_v31 = vpop.f32.mrf.mxu0 }
 0x488   :  { %v1546_v32 = vpop.f32.mrf.mxu0 }
 0x489   :  { %v917_v45 = vpack.c.bf16 %v1546_v32, %v1545_v30 }
 0x48a   :  { %v870_v33 = vpop.f32.mrf.mxu0 }
 0x48b   :  { %v916_v53 = vpack.c.bf16 %v870_v33, %v867_v31 }
 0x48c   :  { %v1549_v34 = vpop.f32.mrf.mxu0 }
 0x48e   :  { %v883_v35 = vpop.f32.mrf.mxu0 }
 0x490   :  { %v1550_v36 = vpop.f32.mrf.mxu0 }
 0x491   :  { %v919_v43 = vpack.c.bf16 %v1550_v36, %v1549_v34 }
 0x492   :  { %v886_v27 = vpop.f32.mrf.mxu0 }
 0x493   :  { %v918_v44 = vpack.c.bf16 %v886_v27, %v883_v35 }
 0x494   :  { %v1553_v37 = vpop.f32.mrf.mxu0 }
 0x496   :  { %v899_v38 = vpop.f32.mrf.mxu0 }
 0x498   :  { %v1554_v39 = vpop.f32.mrf.mxu0 }
 0x499   :  { %v921_v40 = vpack.c.bf16 %v1554_v39, %v1553_v37 }
 0x49a   :  { %v902_v41 = vpop.f32.mrf.mxu0 }
 0x49b   :  { %v920_v42 = vpack.c.bf16 %v902_v41, %v899_v38  ;;  %1555 = vmatprep.subr.bf16.mxu1 %v921_v40 }
 0x49c   :  { %1556 = vmatpush3.bf16.msra.mxu1 %v921_v40 }
 0x49d   :  { %1557 = vmatprep.subr.bf16.mxu1 %v920_v42 }
 0x4a0   :  { %1558 = vmatpush3.bf16.msra.mxu1 %v920_v42 }
 0x4a1   :  { %1559 = vmatprep.subr.bf16.mxu1 %v919_v43 }
 0x4a4   :  { %1560 = vmatpush3.bf16.msra.mxu1 %v919_v43 }
 0x4a5   :  { %1561 = vmatprep.subr.bf16.mxu1 %v918_v44 }
 0x4a8   :  { %1562 = vmatpush3.bf16.msra.mxu1 %v918_v44 }
 0x4a9   :  { %1563 = vmatprep.subr.bf16.mxu1 %v917_v45 }
 0x4ac   :  { %1564 = vmatpush3.bf16.msra.mxu1 %v917_v45 }
 0x4ad   :  { %1565 = vmatprep.subr.bf16.mxu1 %v916_v53 }
 0x4b0   :  { %1566 = vmatpush3.bf16.msra.mxu1 %v916_v53 }
 0x4b1   :  { %1567 = vmatprep.subr.bf16.mxu1 %v915_v54 }
 0x4b4   :  { %1568 = vmatpush3.bf16.msra.mxu1 %v915_v54 }
 0x4b5   :  { %1569 = vmatprep.subr.bf16.mxu1 %v914_v55 }
 0x4b8   :  { %1570 = vmatpush3.bf16.msra.mxu1 %v914_v55 }
 0x4bb   :  { %1572 = vmatmul.mubr.bf16.vlgmr.msra.gmra.mxu1 %v1808_v46 }
 0x4bc   :  { %1575 = vmatprep.mubr.bf16.mxu1 %v1813_v47 }
 0x4c3   :  { %1576 = vmatmul.mubr.bf16.gmra.mxu1 %v1820_v48 }
 0x4c4   :  { %1579 = vmatprep.mubr.bf16.mxu1 %v1825_v49 }
 0x4cb   :  { %1580 = vmatmul.mubr.bf16.gmra.mxu1 %v1832_v50 }
 0x4cc   :  { %1583 = vmatprep.mubr.bf16.mxu1 %v1837_v51 }
 0x4d3   :  { %1584 = vmatmul.mubr.bf16.gmra.mxu1 %v1844_v52 }
 0x57b   :  { %v1573_v46 = vpop.f32.mrf.mxu1 }
 0x57c   :  { %v971_v47 = vadd.f32 %v1573_v46, %v1298_v59 }
 0x57d   :  { %v962_v48 = vpop.f32.mrf.mxu1 }
 0x57e   :  { %v963_v58 = vadd.f32 %v1298_v59, %v962_v48  ;;  %v1030_v49 = vsel %vm1027_vm0, %v971_v47, -1e+30 }
 0x57f   :  { %1048 = vmax.xlane.f32.xlu1 %v1030_v49  ;;  %v1574_v50 = vpop.f32.mrf.mxu1 }
 0x580   :  { %v974_v51 = vadd.f32 %v1574_v50, %v1298_v59  ;;  %v1028_v52 = vsel %vm1027_vm0, %v963_v58, -1e+30 }
 0x581   :  { %v965_v60 = vpop.f32.mrf.mxu1  ;;  %1044 = vmax.xlane.f32.xlu0 %v1028_v52 }
 0x582   :  { %v966_v61 = vadd.f32 %v1298_v59, %v965_v60  ;;  %v1031_v62 = vsel %vm1027_vm0, %v974_v51, -1e+30 }
 0x583   :  { %1050 = vmax.xlane.f32.xlu1 %v1031_v62  ;;  %v1577_v63 = vpop.f32.mrf.mxu1 }
 0x584   :  { %v987_v0 = vadd.f32 %v1577_v63, %v1298_v59  ;;  %v1029_v1 = vsel %vm1027_vm0, %v966_v61, -1e+30 }
 0x585   :  { %v978_v2 = vpop.f32.mrf.mxu1  ;;  %1046 = vmax.xlane.f32.xlu0 %v1029_v1 }
 0x586   :  { %v979_v4 = vadd.f32 %v1298_v59, %v978_v2  ;;  %v1034_v6 = vsel %vm1027_vm0, %v987_v0, -1e+30 }
 0x587   :  { %v1578_v3 = vpop.f32.mrf.mxu1 }
 0x588   :  { %v990_v5 = vadd.f32 %v1578_v3, %v1298_v59  ;;  %v1032_v12 = vsel %vm1027_vm0, %v979_v4, -1e+30 }
 0x589   :  { %v981_v7 = vpop.f32.mrf.mxu1  ;;  %1056 = vmax.xlane.f32.xlu0 %v1034_v6 }
 0x58a   :  { %v982_v8 = vadd.f32 %v1298_v59, %v981_v7  ;;  %v1035_v9 = vsel %vm1027_vm0, %v990_v5, -1e+30 }
 0x58b   :  { %1058 = vmax.xlane.f32.xlu1 %v1035_v9  ;;  %v1581_v10 = vpop.f32.mrf.mxu1 }
 0x58c   :  { %v1003_v11 = vadd.f32 %v1581_v10, %v1298_v59  ;;  %v1033_v14 = vsel %vm1027_vm0, %v982_v8, -1e+30 }
 0x58d   :  { %v994_v13 = vpop.f32.mrf.mxu1  ;;  %1052 = vmax.xlane.f32.xlu0 %v1032_v12 }
 0x58e   :  { %v995_v17 = vadd.f32 %v1298_v59, %v994_v13  ;;  %v1038_v19 = vsel %vm1027_vm0, %v1003_v11, -1e+30 }
 0x58f   :  { %v1582_v15 = vpop.f32.mrf.mxu1  ;;  %1054 = vmax.xlane.f32.xlu1 %v1033_v14 }
 0x590   :  { %v1006_v18 = vadd.f32 %v1582_v15, %v1298_v59  ;;  %v1930_v24 = vsel %vm1027_vm0, %v995_v17, -1e+30 }
 0x591   :  { %v997_v20 = vpop.f32.mrf.mxu1  ;;  %1064 = vmax.xlane.f32.xlu0 %v1038_v19 }
 0x592   :  { %v998_v21 = vadd.f32 %v1298_v59, %v997_v20  ;;  %v1039_v22 = vsel %vm1027_vm0, %v1006_v18, -1e+30 }
 0x593   :  { %v1585_v23 = vpop.f32.mrf.mxu1  ;;  %1066 = vmax.xlane.f32.xlu1 %v1039_v22 }
 0x594   :  { %v1935_v16 = vsel %vm1027_vm0, %v998_v21, -1e+30  ;;  %v1019_v29 = vadd.f32 %v1585_v23, %v1298_v59 }
 0x595   :  { %v1010_v25 = vpop.f32.mrf.mxu1  ;;  %1060 = vmax.xlane.f32.xlu0 %v1930_v24 }
 0x596   :  { %v1011_v26 = vadd.f32 %v1298_v59, %v1010_v25  ;;  %v1949_v35 = vsel %vm1027_vm0, %v1019_v29, -1e+30 }
 0x597   :  { %v1586_v28 = vpop.f32.mrf.mxu1  ;;  %1062 = vmax.xlane.f32.xlu1 %v1935_v16 }
 0x598   :  { %v1940_v30 = vsel %vm1027_vm0, %v1011_v26, -1e+30  ;;  %v1022_v33 = vadd.f32 %v1586_v28, %v1298_v59 }
 0x599   :  { %v1013_v31 = vpop.f32.mrf.mxu1  ;;  %1068 = vmax.xlane.f32.xlu0 %v1940_v30 }
 0x59a   :  { %v1014_v32 = vadd.f32 %v1298_v59, %v1013_v31  ;;  %v1955_v36 = vsel %vm1027_vm0, %v1022_v33, -1e+30 }
 0x59c   :  { %v1945_v34 = vsel %vm1027_vm0, %v1014_v32, -1e+30 }
 0x59d   :  { %1070 = vmax.xlane.f32.xlu1 %v1945_v34  ;;  %1072 = vmax.xlane.f32.xlu0 %v1949_v35 }
 0x5a1   :  { %1074 = vmax.xlane.f32.xlu1 %v1955_v36 }
 0x608   :  { %v1049_v27 = vpop.xlane.xlu1 %1048 }
 0x609   :  { %v1958_v37 = vsub.f32 %v1030_v49, %v1049_v27 }
 0x60a   :  { %v1045_v38 = vpop.xlane.xlu0 %1044 }
 0x60b   :  { %v1096_v39 = vmul.f32 1.442695, %v1958_v37  ;;  %v1961_v40 = vsub.f32 %v1028_v52, %v1045_v38 }
 0x60c   :  { %v1051_v41 = vpop.xlane.xlu1 %1050 }
 0x60d   :  { %1627 = vpow2.f32 %v1096_v39  ;;  %v1092_v42 = vmul.f32 1.442695, %v1961_v40  ;;  %v1964_v43 = vsub.f32 %v1031_v62, %v1051_v41 }
 0x60e   :  { %v1047_v44 = vpop.xlane.xlu0 %1046 }
 0x60f   :  { %1629 = vpow2.f32 %v1092_v42  ;;  %v1098_v45 = vmul.f32 1.442695, %v1964_v43  ;;  %v1967_v53 = vsub.f32 %v1029_v1, %v1047_v44 }
 0x611   :  { %1631 = vpow2.f32 %v1098_v45  ;;  %v1094_v54 = vmul.f32 1.442695, %v1967_v53 }
 0x612   :  { %v1057_v55 = vpop.xlane.xlu0 %1056 }
 0x613   :  { %1633 = vpow2.f32 %v1094_v54  ;;  %v1970_v56 = vsub.f32 %v1034_v6, %v1057_v55 }
 0x614   :  { %v1059_v59 = vpop.xlane.xlu1 %1058 }
 0x615   :  { %v1104_v46 = vmul.f32 1.442695, %v1970_v56  ;;  %v1973_v47 = vsub.f32 %v1035_v9, %v1059_v59 }
 0x616   :  { %v1053_v48 = vpop.xlane.xlu0 %1052 }
 0x617   :  { %1635 = vpow2.f32 %v1104_v46  ;;  %v1106_v58 = vmul.f32 1.442695, %v1973_v47  ;;  %v1976_v49 = vsub.f32 %v1032_v12, %v1053_v48 }
 0x618   :  { %v1055_v50 = vpop.xlane.xlu1 %1054 }
 0x619   :  { %1637 = vpow2.f32 %v1106_v58  ;;  %v1100_v51 = vmul.f32 1.442695, %v1976_v49  ;;  %v1979_v52 = vsub.f32 %v1033_v14, %v1055_v50 }
 0x61a   :  { %v1628_v60 = vpop.eup %1627  ;;  %v1065_v61 = vpop.xlane.xlu0 %1064 }
 0x61b   :  { %1639 = vpow2.f32 %v1100_v51  ;;  %v1102_v62 = vmul.f32 1.442695, %v1979_v52  ;;  %v1982_v63 = vsub.f32 %v1038_v19, %v1065_v61  ;;  %v1126_v0 = vsel %vm1027_vm0, %v1628_v60, 0.0 }
 0x61c   :  { %v1630_v1 = vpop.eup %1629  ;;  %v1067_v2 = vpop.xlane.xlu1 %1066  ;;  %1144 = vadd.xlane.f32.xlu0 %v1126_v0 }
 0x61d   :  { %1641 = vpow2.f32 %v1102_v62  ;;  %v1112_v3 = vmul.f32 1.442695, %v1982_v63  ;;  %v1987_v4 = vsub.f32 %v1039_v22, %v1067_v2  ;;  %v1124_v7 = vsel %vm1027_vm0, %v1630_v1, 0.0 }
 0x61e   :  { %v1632_v5 = vpop.eup %1631  ;;  %v1061_v6 = vpop.xlane.xlu0 %1060 }
 0x61f   :  { %1643 = vpow2.f32 %v1112_v3  ;;  %v1114_v8 = vmul.f32 1.442695, %v1987_v4  ;;  %v1993_v9 = vsub.f32 %v1930_v24, %v1061_v6  ;;  %v1127_v10 = vsel %vm1027_vm0, %v1632_v5, 0.0 }
 0x620   :  { %v1634_v11 = vpop.eup %1633  ;;  %1146 = vadd.xlane.f32.xlu1 %v1127_v10  ;;  %v1063_v12 = vpop.xlane.xlu1 %1062  ;;  %1140 = vadd.xlane.f32.xlu0 %v1124_v7 }
 0x621   :  { %1645 = vpow2.f32 %v1114_v8  ;;  %v1108_v13 = vmul.f32 1.442695, %v1993_v9  ;;  %v1999_v14 = vsub.f32 %v1935_v16, %v1063_v12  ;;  %v1125_v19 = vsel %vm1027_vm0, %v1634_v11, 0.0 }
 0x622   :  { %v1069_v15 = vpop.xlane.xlu0 %1068 }
 0x623   :  { %1647 = vpow2.f32 %v1108_v13  ;;  %v1110_v17 = vmul.f32 1.442695, %v1999_v14  ;;  %v2003_v18 = vsub.f32 %v1940_v30, %v1069_v15 }
 0x624   :  { %v1636_v20 = vpop.eup %1635  ;;  %1142 = vadd.xlane.f32.xlu1 %v1125_v19 }
 0x625   :  { %1649 = vpow2.f32 %v1110_v17  ;;  %v1116_v21 = vmul.f32 1.442695, %v2003_v18  ;;  %v1130_v22 = vsel %vm1027_vm0, %v1636_v20, 0.0 }
 0x626   :  { %v1638_v23 = vpop.eup %1637  ;;  %v1071_v24 = vpop.xlane.xlu1 %1070  ;;  %1152 = vadd.xlane.f32.xlu0 %v1130_v22 }
 0x627   :  { %v1073_v25 = vpop.xlane.xlu0 %1072  ;;  %1651 = vpow2.f32 %v1116_v21  ;;  %v2011_v26 = vsub.f32 %v1945_v34, %v1071_v24  ;;  %v1131_v28 = vsel %vm1027_vm0, %v1638_v23, 0.0 }
 0x628   :  { %v2014_v16 = vsub.f32 %v1949_v35, %v1073_v25  ;;  %v1640_v29 = vpop.eup %1639  ;;  %1154 = vadd.xlane.f32.xlu1 %v1131_v28 }
 0x629   :  { %v1118_v30 = vmul.f32 1.442695, %v2011_v26  ;;  %v1128_v32 = vsel %vm1027_vm0, %v1640_v29, 0.0 }
 0x62a   :  { %v1120_v31 = vmul.f32 1.442695, %v2014_v16  ;;  %v1642_v33 = vpop.eup %1641  ;;  %v1075_v27 = vpop.xlane.xlu1 %1074  ;;  %1148 = vadd.xlane.f32.xlu0 %v1128_v32 }
 0x62b   :  { %1653 = vpow2.f32 %v1118_v30  ;;  %v2023_v34 = vsub.f32 %v1955_v36, %v1075_v27  ;;  %v1129_v35 = vsel %vm1027_vm0, %v1642_v33, 0.0 }
 0x62c   :  { %v1644_v38 = vpop.eup %1643  ;;  %1655 = vpow2.f32 %v1120_v31  ;;  %1150 = vadd.xlane.f32.xlu1 %v1129_v35 }
 0x62d   :  { %v1122_v39 = vmul.f32 1.442695, %v2023_v34  ;;  %v1134_v41 = vsel %vm1027_vm0, %v1644_v38, 0.0 }
 0x62e   :  { %v1646_v42 = vpop.eup %1645  ;;  %1160 = vadd.xlane.f32.xlu0 %v1134_v41 }
 0x62f   :  { %1657 = vpow2.f32 %v1122_v39  ;;  %v1135_v44 = vsel %vm1027_vm0, %v1646_v42, 0.0 }
 0x630   :  { %v1648_v45 = vpop.eup %1647  ;;  %1162 = vadd.xlane.f32.xlu1 %v1135_v44 }
 0x631   :  { %v1132_v36 = vsel %vm1027_vm0, %v1648_v45, 0.0 }
 0x632   :  { %v1650_v54 = vpop.eup %1649  ;;  %1156 = vadd.xlane.f32.xlu0 %v1132_v36 }
 0x633   :  { %v1133_v55 = vsel %vm1027_vm0, %v1650_v54, 0.0 }
 0x634   :  { %v1652_v59 = vpop.eup %1651  ;;  %1158 = vadd.xlane.f32.xlu1 %v1133_v55 }
 0x635   :  { %v1136_v46 = vsel %vm1027_vm0, %v1652_v59, 0.0 }
 0x636   :  { %1164 = vadd.xlane.f32.xlu0 %v1136_v46 }
 0x638   :  { %v1654_v48 = vpop.eup %1653 }
 0x639   :  { %v1656_v58 = vpop.eup %1655  ;;  %v1137_v50 = vsel %vm1027_vm0, %v1654_v48, 0.0 }
 0x63a   :  { %1166 = vadd.xlane.f32.xlu1 %v1137_v50  ;;  %v1138_v51 = vsel %vm1027_vm0, %v1656_v58, 0.0 }
 0x63b   :  { %1168 = vadd.xlane.f32.xlu0 %v1138_v51 }
 0x63c   :  { %v1658_v60 = vpop.eup %1657 }
 0x63d   :  { %v1139_v61 = vsel %vm1027_vm0, %v1658_v60, 0.0 }
 0x63e   :  { %1170 = vadd.xlane.f32.xlu1 %v1139_v61 }
 0x6a5   :  { %v1145_v62 = vpop.xlane.xlu0 %1144 }
 0x6a6   :  { %1659 = vlog2.f32 %v1145_v62 }
 0x6a9   :  { %v1147_v0 = vpop.xlane.xlu1 %1146  ;;  %v1141_v1 = vpop.xlane.xlu0 %1140 }
 0x6aa   :  { %1661 = vlog2.f32 %v1147_v0 }
 0x6ab   :  { %1663 = vlog2.f32 %v1141_v1 }
 0x6ad   :  { %v1143_v2 = vpop.xlane.xlu1 %1142 }
 0x6ae   :  { %1665 = vlog2.f32 %v1143_v2 }
 0x6af   :  { %v1153_v3 = vpop.xlane.xlu0 %1152 }
 0x6b0   :  { %1667 = vlog2.f32 %v1153_v3 }
 0x6b1   :  { %v1155_v5 = vpop.xlane.xlu1 %1154 }
 0x6b2   :  { %1669 = vlog2.f32 %v1155_v5 }
 0x6b3   :  { %v1660_v6 = vpop.eup %1659  ;;  %v1149_v7 = vpop.xlane.xlu0 %1148 }
 0x6b4   :  { %v1177_v8 = vmul.f32 0.6931472, %v1660_v6  ;;  %1671 = vlog2.f32 %v1149_v7 }
 0x6b5   :  { %v1151_v10 = vpop.xlane.xlu1 %1150 }
 0x6b6   :  { %v1206_v11 = vsub.f32 %v1958_v37, %v1177_v8  ;;  %1673 = vlog2.f32 %v1151_v10 }
 0x6b7   :  { %v1662_v12 = vpop.eup %1661  ;;  %v1161_v13 = vpop.xlane.xlu0 %1160 }
 0x6b8   :  { %v1664_v15 = vpop.eup %1663  ;;  %v1222_v17 = vsel %vm1027_vm0, %v1206_v11, 0.0  ;;  %v1179_v19 = vmul.f32 0.6931472, %v1662_v12  ;;  %1675 = vlog2.f32 %v1161_v13 }
 0x6b9   :  { %1238 = vst [vmem:[%s2148_s8 + $0x10] sm:$0xff] %v1222_v17  ;;  %v1173_v20 = vmul.f32 0.6931472, %v1664_v15  ;;  %v1163_v21 = vpop.xlane.xlu1 %1162 }
 0x6ba   :  { %v1207_v22 = vsub.f32 %v1964_v43, %v1179_v19  ;;  %1677 = vlog2.f32 %v1163_v21 }
 0x6bb   :  { %v1666_v23 = vpop.eup %1665  ;;  %v1204_v37 = vsub.f32 %v1961_v40, %v1173_v20  ;;  %v1157_v24 = vpop.xlane.xlu0 %1156 }
 0x6bc   :  { %v1223_v25 = vsel %vm1027_vm0, %v1207_v22, 0.0  ;;  %v1175_v28 = vmul.f32 0.6931472, %v1666_v23  ;;  %1679 = vlog2.f32 %v1157_v24 }
 0x6bd   :  { %v1668_v29 = vpop.eup %1667  ;;  %1239 = vst [vmem:[%s2148_s8 + $0x18] sm:$0xff] %v1223_v25  ;;  %v1220_v30 = vsel %vm1027_vm0, %v1204_v37, 0.0  ;;  %v1159_v31 = vpop.xlane.xlu1 %1158 }
 0x6be   :  { %1236 = vst [vmem:[%s2148_s8] sm:$0xff] %v1220_v30  ;;  %v1205_v40 = vsub.f32 %v1967_v53, %v1175_v28  ;;  %v1185_v43 = vmul.f32 0.6931472, %v1668_v29  ;;  %1681 = vlog2.f32 %v1159_v31 }
 0x6bf   :  { %v1670_v32 = vpop.eup %1669  ;;  %v1165_v33 = vpop.xlane.xlu0 %1164 }
 0x6c0   :  { %v1221_v27 = vsel %vm1027_vm0, %v1205_v40, 0.0  ;;  %v1210_v35 = vsub.f32 %v1970_v56, %v1185_v43  ;;  %v1187_v38 = vmul.f32 0.6931472, %v1670_v32  ;;  %1683 = vlog2.f32 %v1165_v33 }
 0x6c1   :  { %v1672_v39 = vpop.eup %1671  ;;  %1237 = vst [vmem:[%s2148_s8 + $0x8] sm:$0xff] %v1221_v27 }
 0x6c2   :  { %v1226_v41 = vsel %vm1027_vm0, %v1210_v35, 0.0  ;;  %v1211_v53 = vsub.f32 %v1973_v47, %v1187_v38  ;;  %v1181_v42 = vmul.f32 0.6931472, %v1672_v39 }
 0x6c3   :  { %v1674_v44 = vpop.eup %1673  ;;  %1242 = vst [vmem:[%s2148_s8 + $0x30] sm:$0xff] %v1226_v41  ;;  %v1167_v45 = vpop.xlane.xlu1 %1166 }
 0x6c4   :  { %v1227_v56 = vsel %vm1027_vm0, %v1211_v53, 0.0  ;;  %v1208_v36 = vsub.f32 %v1976_v49, %v1181_v42  ;;  %v1183_v54 = vmul.f32 0.6931472, %v1674_v44  ;;  %1685 = vlog2.f32 %v1167_v45  ;;  %v1169_v55 = vpop.xlane.xlu0 %1168 }
 0x6c5   :  { %v1676_v59 = vpop.eup %1675  ;;  %1243 = vst [vmem:[%s2148_s8 + $0x38] sm:$0xff] %v1227_v56  ;;  %1687 = vlog2.f32 %v1169_v55 }
 0x6c6   :  { %v1224_v47 = vsel %vm1027_vm0, %v1208_v36, 0.0  ;;  %v1209_v46 = vsub.f32 %v1979_v52, %v1183_v54  ;;  %v1193_v48 = vmul.f32 0.6931472, %v1676_v59 }
 0x6c7   :  { %v1678_v58 = vpop.eup %1677  ;;  %1240 = vst [vmem:[%s2148_s8 + $0x20] sm:$0xff] %v1224_v47  ;;  %v1171_v49 = vpop.xlane.xlu1 %1170 }
 0x6c8   :  { %v1225_v50 = vsel %vm1027_vm0, %v1209_v46, 0.0  ;;  %v1214_v51 = vsub.f32 %v1982_v63, %v1193_v48  ;;  %v1195_v60 = vmul.f32 0.6931472, %v1678_v58  ;;  %1689 = vlog2.f32 %v1171_v49 }
 0x6c9   :  { %v1680_v61 = vpop.eup %1679  ;;  %1241 = vst [vmem:[%s2148_s8 + $0x28] sm:$0xff] %v1225_v50 }
 0x6ca   :  { %v1230_v52 = vsel %vm1027_vm0, %v1214_v51, 0.0  ;;  %v1215_v62 = vsub.f32 %v1987_v4, %v1195_v60  ;;  %v1189_v0 = vmul.f32 0.6931472, %v1680_v61 }
 0x6cb   :  { %v1682_v1 = vpop.eup %1681  ;;  %1246 = vst [vmem:[%s2148_s8 + $0x50] sm:$0xff] %v1230_v52 }
 0x6cc   :  { %v1231_v63 = vsel %vm1027_vm0, %v1215_v62, 0.0  ;;  %v1212_v2 = vsub.f32 %v1993_v9, %v1189_v0  ;;  %v1191_v3 = vmul.f32 0.6931472, %v1682_v1 }
 0x6cd   :  { %v1684_v5 = vpop.eup %1683  ;;  %1247 = vst [vmem:[%s2148_s8 + $0x58] sm:$0xff] %v1231_v63 }
 0x6ce   :  { %v1228_v4 = vsel %vm1027_vm0, %v1212_v2, 0.0  ;;  %v1213_v6 = vsub.f32 %v1999_v14, %v1191_v3  ;;  %v1197_v7 = vmul.f32 0.6931472, %v1684_v5 }
 0x6cf   :  { %1244 = vst [vmem:[%s2148_s8 + $0x40] sm:$0xff] %v1228_v4 }
 0x6d0   :  { %v1229_v8 = vsel %vm1027_vm0, %v1213_v6, 0.0  ;;  %v1216_v9 = vsub.f32 %v2003_v18, %v1197_v7 }
 0x6d1   :  { %v1686_v10 = vpop.eup %1685  ;;  %1245 = vst [vmem:[%s2148_s8 + $0x48] sm:$0xff] %v1229_v8 }
 0x6d2   :  { %v1688_v11 = vpop.eup %1687  ;;  %v1232_v12 = vsel %vm1027_vm0, %v1216_v9, 0.0  ;;  %v1199_v14 = vmul.f32 0.6931472, %v1686_v10 }
 0x6d3   :  { %1248 = vst [vmem:[%s2148_s8 + $0x60] sm:$0xff] %v1232_v12  ;;  %v1201_v13 = vmul.f32 0.6931472, %v1688_v11 }
 0x6d4   :  { %v1217_v15 = vsub.f32 %v2011_v26, %v1199_v14 }
 0x6d5   :  { %v1690_v17 = vpop.eup %1689  ;;  %v1218_v18 = vsub.f32 %v2014_v16, %v1201_v13 }
 0x6d6   :  { %v1233_v19 = vsel %vm1027_vm0, %v1217_v15, 0.0  ;;  %v1203_v20 = vmul.f32 0.6931472, %v1690_v17 }
 0x6d7   :  { %1249 = vst [vmem:[%s2148_s8 + $0x68] sm:$0xff] %v1233_v19  ;;  %v1234_v21 = vsel %vm1027_vm0, %v1218_v18, 0.0 }
 0x6d8   :  { %1250 = vst [vmem:[%s2148_s8 + $0x70] sm:$0xff] %v1234_v21  ;;  %v1219_v26 = vsub.f32 %v2023_v34, %v1203_v20 }
 0x6da   :  { %v1235_v16 = vsel %vm1027_vm0, %v1219_v26, 0.0 }
 0x6db   :  { %1251 = vst [vmem:[%s2148_s8 + $0x78] sm:$0xff] %v1235_v16 }

</bundles_post_ra>
